<compile_context>
chip_gen: v5e
topology: v5e:2x2
jax: 0.10.0
libtpu: 0.0.40
codegen_flags: <defaults>
</compile_context>

<pallas_src>
import functools
import math

import jax
import jax.numpy as jnp
from jax.experimental import pallas as pl
from jax.experimental.pallas import tpu as pltpu

_LANE = 128
# Stay under v7x's 64 MiB per-TensorCore VMEM; also used as the explicit
# vmem_limit_bytes ceiling (v5e's default scoped limit is only 16 MiB).
_VMEM_BUDGET_BYTES = 56 * 1024 * 1024


def _round_up(x, m):
    return ((x + m - 1) // m) * m


def _pick_tile(padded_dim, pref=512):
    """Largest multiple of 128 that divides `padded_dim` and is <= pref."""
    best = _LANE
    t = _LANE
    limit = min(pref, padded_dim)
    while t <= limit:
        if padded_dim % t == 0:
            best = t
        t += _LANE
    return best


# ----------------------------------------------------------------------------
# Kernel 1: feature matmul  s = x @ W  with W fully resident (no K grid axis).
# ----------------------------------------------------------------------------
def _feat_matmul_kernel(x_ref, w_ref, o_ref):
    o_ref[...] = jnp.dot(x_ref[...], w_ref[...],
                         preferred_element_type=jnp.float32).astype(o_ref.dtype)


def _feature_matmul(x, w, *, out_dtype, tm):
    Mp, Kp = x.shape
    Kp2, Wout = w.shape
    assert Kp == Kp2 and Mp % tm == 0, (x.shape, w.shape, tm)
    grid = (Mp // tm,)
    cost = pl.CostEstimate(
        flops=2 * Mp * Kp * Wout,
        transcendentals=0,
        bytes_accessed=(x.size * x.dtype.itemsize + w.size * w.dtype.itemsize
                        + Mp * Wout * jnp.dtype(out_dtype).itemsize))
    return pl.pallas_call(
        _feat_matmul_kernel,
        out_shape=jax.ShapeDtypeStruct((Mp, Wout), out_dtype),
        grid_spec=pltpu.PrefetchScalarGridSpec(
            num_scalar_prefetch=0,
            grid=grid,
            in_specs=[pl.BlockSpec((tm, Kp), lambda i: (i, 0)),
                      pl.BlockSpec((Kp, Wout), lambda i: (0, 0))],
            out_specs=pl.BlockSpec((tm, Wout), lambda i: (i, 0)),
        ),
        compiler_params=pltpu.CompilerParams(
            dimension_semantics=("parallel",),
            vmem_limit_bytes=_VMEM_BUDGET_BYTES),
        cost_estimate=cost,
    )(x, w)


# ----------------------------------------------------------------------------
# Kernel 2/3: adjacency matmul with f32 accumulator.
#   w_next is None :  out = adj @ rhs + bias
#   w_next given   :  out = relu(adj @ rhs + bias) @ w_next   (fused epilogue)
# The RHS (rhs) is either fully VMEM-resident (sliced in-kernel by k) or
# streamed per K tile when it would not fit the VMEM budget.
# ----------------------------------------------------------------------------
def _make_adj_kernel(tk, resident_rhs, fuse_w):
    align = tk & (-tk)  # largest power-of-two divisor of tk (alignment hint)

    def kernel(*refs):
        if fuse_w:
            a_ref, b_ref, bias_ref, w_ref, o_ref, acc_ref = refs
        else:
            a_ref, b_ref, bias_ref, o_ref, acc_ref = refs
            w_ref = None
        k = pl.program_id(1)

        @pl.when(k == 0)
        def _init():
            acc_ref[...] = jnp.zeros_like(acc_ref)

        if resident_rhs:
            off = pl.multiple_of(k * tk, align)
            b_blk = b_ref[pl.ds(off, tk), :]
        else:
            b_blk = b_ref[...]
        acc_ref[...] += jnp.dot(a_ref[...], b_blk,
                                preferred_element_type=jnp.float32)

        @pl.when(k == pl.num_programs(1) - 1)
        def _store():
            r = acc_ref[...] + bias_ref[...].astype(jnp.float32)
            if fuse_w:
                r = jnp.maximum(r, 0.0)
                r = jnp.dot(r.astype(w_ref.dtype), w_ref[...],
                            preferred_element_type=jnp.float32)
            o_ref[...] = r.astype(o_ref.dtype)

    return kernel


def _adj_matmul(adj, rhs, bias, w_next=None, *, out_dtype, tm, tk):
    Np = adj.shape[0]
    K, Wb = rhs.shape
    assert adj.shape == (Np, Np) and K == Np, (adj.shape, rhs.shape)
    assert Np % tm == 0 and Np % tk == 0, (Np, tm, tk)
    Wo = Wb if w_next is None else w_next.shape[1]
    grid = (Np // tm, Np // tk)

    # VMEM budget: adj tile (2 bufs) + accumulator + output tile (2 bufs)
    # + resident weight/bias + RHS (resident or streamed, 2 bufs pessimistic).
    bs = rhs.dtype.itemsize
    fixed = (2 * tm * tk * adj.dtype.itemsize
             + tm * Wb * 4
             + 2 * tm * Wo * jnp.dtype(out_dtype).itemsize
             + (0 if w_next is None else 2 * w_next.size * w_next.dtype.itemsize)
             + 2 * bias.size * bias.dtype.itemsize)
    resident_rhs = fixed + 2 * Np * Wb * bs <= _VMEM_BUDGET_BYTES

    if resident_rhs:
        rhs_spec = pl.BlockSpec((Np, Wb), lambda i, k: (0, 0))
        rhs_bytes = Np * Wb * bs                      # read from HBM once
        vmem_need = fixed + 2 * Np * Wb * bs
    else:
        rhs_spec = pl.BlockSpec((tk, Wb), lambda i, k: (k, 0))
        rhs_bytes = (Np // tm) * Np * Wb * bs         # re-read once per row tile
        vmem_need = fixed + 2 * tk * Wb * bs
    vmem_limit = int(min(max(32 * 1024 * 1024, vmem_need + vmem_need // 2),
                         _VMEM_BUDGET_BYTES))

    flops = 2 * Np * Np * Wb + (0 if w_next is None else 2 * Np * Wb * Wo)
    cost = pl.CostEstimate(
        flops=flops,
        transcendentals=0,
        bytes_accessed=(adj.size * adj.dtype.itemsize + rhs_bytes
                        + bias.size * bias.dtype.itemsize
                        + (0 if w_next is None
                           else w_next.size * w_next.dtype.itemsize)
                        + Np * Wo * jnp.dtype(out_dtype).itemsize))

    in_specs = [pl.BlockSpec((tm, tk), lambda i, k: (i, k)),
                rhs_spec,
                pl.BlockSpec((1, Wb), lambda i, k: (0, 0))]
    args = [adj, rhs, bias]
    if w_next is not None:
        in_specs.append(pl.BlockSpec(w_next.shape, lambda i, k: (0, 0)))
        args.append(w_next)

    kernel = _make_adj_kernel(tk, resident_rhs, w_next is not None)

    return pl.pallas_call(
        kernel,
        out_shape=jax.ShapeDtypeStruct((Np, Wo), out_dtype),
        grid_spec=pltpu.PrefetchScalarGridSpec(
            num_scalar_prefetch=0,
            grid=grid,
            in_specs=in_specs,
            out_specs=pl.BlockSpec((tm, Wo), lambda i, k: (i, 0)),
            scratch_shapes=[pltpu.VMEM((tm, Wb), jnp.float32)],
        ),
        compiler_params=pltpu.CompilerParams(
            dimension_semantics=("parallel", "arbitrary"),
            vmem_limit_bytes=vmem_limit),
        cost_estimate=cost,
    )(*args)


# ----------------------------------------------------------------------------
# Padding / cast hoisted out of the hot path; jitted forward on padded arrays.
# ----------------------------------------------------------------------------
def prepare_gcn_inputs(x, adj, w1, b1, w2, b2, *, compute_dtype=jnp.bfloat16,
                       tile_pref=512):
    """Pad to lane-dense 128-multiples and cast MXU operands to bf16, ONCE."""
    N, nfeat = x.shape
    nhid = w1.shape[1]
    nclass = w2.shape[1]

    Np = _round_up(N, _LANE)
    Fp = _round_up(nfeat, _LANE)
    Hp = _round_up(nhid, _LANE)
    Cp = _round_up(nclass, _LANE)

    xp = jnp.pad(x, ((0, Np - N), (0, Fp - nfeat))).astype(compute_dtype)
    adjp = jnp.pad(adj, ((0, Np - N), (0, Np - N))).astype(compute_dtype)
    w1p = jnp.pad(w1, ((0, Fp - nfeat), (0, Hp - nhid))).astype(compute_dtype)
    w2p = jnp.pad(w2, ((0, Hp - nhid), (0, Cp - nclass))).astype(compute_dtype)
    b1p = jnp.pad(b1.reshape(1, -1), ((0, 0), (0, Hp - nhid))).astype(jnp.float32)
    b2p = jnp.pad(b2.reshape(1, -1), ((0, 0), (0, Cp - nclass))).astype(jnp.float32)

    return dict(xp=xp, adjp=adjp, w1p=w1p, b1p=b1p, w2p=w2p, b2p=b2p,
                n_nodes=N, n_class=nclass, tile=_pick_tile(Np, tile_pref))


@functools.partial(jax.jit, static_argnames=("tile",))
def gcn_forward_padded(xp, adjp, w1p, b1p, w2p, b2p, *, tile=512):
    """Hot path: padded logits [Np, Cp] f32; no padding/casting inside."""
    t = tile
    # Layer-1 support: s1 = x @ W1  (W1 resident, single pass over x).
    s1 = _feature_matmul(xp, w1p, out_dtype=xp.dtype, tm=t)
    # Fused: s2 = relu(adj @ s1 + b1) @ W2   (h never written to HBM).
    s2 = _adj_matmul(adjp, s1, b1p, w_next=w2p, out_dtype=xp.dtype, tm=t, tk=t)
    # Layer-2 aggregation: out = adj @ s2 + b2.
    return _adj_matmul(adjp, s2, b2p, out_dtype=jnp.float32, tm=t, tk=t)


def gcn_forward(x, adj, w1, b1, w2, b2, *, compute_dtype=jnp.bfloat16):
    """Convenience wrapper: pad + forward + slice back to [N, nclass]."""
    prep = prepare_gcn_inputs(x, adj, w1, b1, w2, b2,
                              compute_dtype=compute_dtype)
    outp = gcn_forward_padded(prep["xp"], prep["adjp"], prep["w1p"],
                              prep["b1p"], prep["w2p"], prep["b2p"],
                              tile=prep["tile"])
    return outp[:prep["n_nodes"], :prep["n_class"]]


def gcn_reference(x, adj, w1, b1, w2, b2, compute_dtype=jnp.bfloat16):
    """Pure-JAX reference with the same bf16-operand / f32-accumulate recipe."""
    cd = compute_dtype
    s1 = jnp.dot(x.astype(cd), w1.astype(cd), preferred_element_type=jnp.float32)
    h = jnp.dot(adj.astype(cd), s1.astype(cd),
                preferred_element_type=jnp.float32) + b1
    h = jnp.maximum(h, 0.0)
    s2 = jnp.dot(h.astype(cd), w2.astype(cd), preferred_element_type=jnp.float32)
    out = jnp.dot(adj.astype(cd), s2.astype(cd),
                  preferred_element_type=jnp.float32) + b2
    return out


def init_gcn_params(key, nfeat, nhid, nclass):
    """Mimics GraphConvolution.reset_parameters: U(-stdv, stdv), stdv=1/sqrt(out)."""
    k1, k2, k3, k4 = jax.random.split(key, 4)
    stdv1 = 1.0 / math.sqrt(nhid)
    stdv2 = 1.0 / math.sqrt(nclass)
    w1 = jax.random.uniform(k1, (nfeat, nhid), jnp.float32, -stdv1, stdv1)
    b1 = jax.random.uniform(k2, (nhid,), jnp.float32, -stdv1, stdv1)
    w2 = jax.random.uniform(k3, (nhid, nclass), jnp.float32, -stdv2, stdv2)
    b2 = jax.random.uniform(k4, (nclass,), jnp.float32, -stdv2, stdv2)
    return w1, b1, w2, b2


if __name__ == "__main__":
    # TODO(synk): self.dropout is stored in GCN.__init__ but never applied in
    # forward, so it is intentionally omitted here.
    N, nfeat, nhid, nclass = 16, 32, 32, 8

    key = jax.random.PRNGKey(0)
    kx, kadj, kparams = jax.random.split(key, 3)

    x = jax.random.normal(kx, (N, nfeat), jnp.float32)

    # Dense symmetric normalized adjacency with self-loops.
    a = (jax.random.uniform(kadj, (N, N)) < 0.3).astype(jnp.float32)
    a = jnp.maximum(a, a.T) + jnp.eye(N, dtype=jnp.float32)
    deg = jnp.sum(a, axis=1)
    d_inv_sqrt = 1.0 / jnp.sqrt(deg)
    adj = a * d_inv_sqrt[:, None] * d_inv_sqrt[None, :]

    w1, b1, w2, b2 = init_gcn_params(kparams, nfeat, nhid, nclass)

    # Pad/cast once (hoisted), then run the jitted padded forward (hot path).
    prep = prepare_gcn_inputs(x, adj, w1, b1, w2, b2)
    outp = gcn_forward_padded(prep["xp"], prep["adjp"], prep["w1p"],
                              prep["b1p"], prep["w2p"], prep["b2p"],
                              tile=prep["tile"])
    outp = jax.block_until_ready(outp)
    out = outp[:N, :nclass]

    # Check against a bf16-emulated JAX reference (same numerics recipe) and,
    # loosely, against the pure-f32 reference semantics.
    ref_bf16 = gcn_reference(x, adj, w1, b1, w2, b2)
    h_f32 = jnp.maximum(adj @ (x @ w1) + b1, 0.0)
    ref_f32 = adj @ (h_f32 @ w2) + b2

    assert out.shape == (N, nclass)
    assert jnp.allclose(out, ref_bf16, atol=1e-2, rtol=1e-2)
    assert jnp.allclose(out, ref_f32, atol=1e-1, rtol=1e-1)

    print("KERNEL_OK")
</pallas_src>

<mosaic_0001>
module attributes {stable_mosaic.version = 11 : i64} {
  func.func @_feat_matmul_kernel(%arg0: i32, %arg1: memref<128x128xbf16, #tpu.memory_space<vmem>>, %arg2: memref<128x128xbf16, #tpu.memory_space<vmem>>, %arg3: memref<128x128xbf16, #tpu.memory_space<vmem>>) attributes {dimension_semantics = [#tpu.dimension_semantics<parallel>], iteration_bounds = array<i64: 1>, scalar_prefetch = 0 : i64, scratch_operands = 0 : i64, tpu.core_type = #tpu.core_type<tc>, window_params = [{transform_indices = @transform_0, window_bounds = array<i64: 128, 128>}, {pipeline_mode = #tpu.pipeline_mode<synchronous>, transform_indices = @transform_1, window_bounds = array<i64: 128, 128>}, {transform_indices = @transform_2, window_bounds = array<i64: 128, 128>}]} {
    %c0 = arith.constant 0 : index
    %c0_0 = arith.constant 0 : index
    %0 = vector.load %arg1[%c0, %c0_0] : memref<128x128xbf16, #tpu.memory_space<vmem>>, vector<128x128xbf16>
    %c0_1 = arith.constant 0 : index
    %c0_2 = arith.constant 0 : index
    %1 = vector.load %arg2[%c0_1, %c0_2] : memref<128x128xbf16, #tpu.memory_space<vmem>>, vector<128x128xbf16>
    %cst = arith.constant dense<0.000000e+00> : vector<128x128xf32>
    %2 = tpu.matmul %0, %1, %cst {dimension_numbers = #tpu.dot_dimension_numbers<[1], [0], [0], [1], [0, 0, 1, 1], [], []>} : vector<128x128xbf16>, vector<128x128xbf16>, vector<128x128xf32> -> vector<128x128xf32>
    %3 = arith.truncf %2 : vector<128x128xf32> to vector<128x128xbf16>
    %c0_3 = arith.constant 0 : index
    %c0_4 = arith.constant 0 : index
    %4 = vector.load %arg3[%c0_3, %c0_4] : memref<128x128xbf16, #tpu.memory_space<vmem>>, vector<128x128xbf16>
    tpu.vector_store %arg3[%c0_3, %c0_4], %3 {strides = array<i32>} : memref<128x128xbf16, #tpu.memory_space<vmem>>, vector<128x128xbf16>,
    return
  }
  func.func @transform_0(%arg0: i32) -> (i32, i32) {
    %c0_i32 = arith.constant 0 : i32
    %c0_i32_0 = arith.constant 0 : i32
    return %arg0, %c0_i32 : i32, i32
  }
  func.func @transform_1(%arg0: i32) -> (i32, i32) {
    %c0_i32 = arith.constant 0 : i32
    %c0_i32_0 = arith.constant 0 : i32
    %c0_i32_1 = arith.constant 0 : i32
    return %c0_i32, %c0_i32_0 : i32, i32
  }
  func.func @transform_2(%arg0: i32) -> (i32, i32) {
    %c0_i32 = arith.constant 0 : i32
    %c0_i32_0 = arith.constant 0 : i32
    return %arg0, %c0_i32 : i32, i32
  }
}

module attributes {stable_mosaic.version = 11 : i64} {
  func.func @kernel(%arg0: i32, %arg1: i32, %arg2: memref<128x128xbf16, #tpu.memory_space<vmem>>, %arg3: memref<128x128xbf16, #tpu.memory_space<vmem>>, %arg4: memref<1x128xf32, #tpu.memory_space<vmem>>, %arg5: memref<128x128xbf16, #tpu.memory_space<vmem>>, %arg6: memref<128x128xbf16, #tpu.memory_space<vmem>>, %arg7: memref<128x128xf32, #tpu.memory_space<vmem>>) attributes {dimension_semantics = [#tpu.dimension_semantics<parallel>, #tpu.dimension_semantics<arbitrary>], iteration_bounds = array<i64: 1, 1>, scalar_prefetch = 0 : i64, scratch_operands = 1 : i64, tpu.core_type = #tpu.core_type<tc>, window_params = [{transform_indices = @transform_0, window_bounds = array<i64: 128, 128>}, {pipeline_mode = #tpu.pipeline_mode<synchronous>, transform_indices = @transform_1, window_bounds = array<i64: 128, 128>}, {pipeline_mode = #tpu.pipeline_mode<synchronous>, transform_indices = @transform_2, window_bounds = array<i64: 1, 128>}, {pipeline_mode = #tpu.pipeline_mode<synchronous>, transform_indices = @transform_3, window_bounds = array<i64: 128, 128>}, {transform_indices = @transform_4, window_bounds = array<i64: 128, 128>}]} {
    %c0_i32 = arith.constant 0 : i32
    %0 = arith.cmpi eq, %arg1, %c0_i32 : i32
    %1 = arith.extui %0 : i1 to i32
    %c0_i32_0 = arith.constant 0 : i32
    %2 = arith.cmpi ne, %1, %c0_i32_0 : i32
    scf.if %2 {
      %cst_9 = arith.constant 0.000000e+00 : f32
      %15 = vector.broadcast %cst_9 : f32 to vector<128x128xf32>
      %c0_10 = arith.constant 0 : index
      %c0_11 = arith.constant 0 : index
      %16 = vector.load %arg7[%c0_10, %c0_11] : memref<128x128xf32, #tpu.memory_space<vmem>>, vector<128x128xf32>
      tpu.vector_store %arg7[%c0_10, %c0_11], %15 {strides = array<i32>} : memref<128x128xf32, #tpu.memory_space<vmem>>, vector<128x128xf32>,
    } else {
    }
    %c128_i32 = arith.constant 128 : i32
    %3 = arith.muli %arg1, %c128_i32 : i32
    %4 = tpu.assume_multiple %3, 128 : i32
    %5 = arith.index_cast %4 : i32 to index
    %c0 = arith.constant 0 : index
    %6 = vector.load %arg3[%5, %c0] : memref<128x128xbf16, #tpu.memory_space<vmem>>, vector<128x128xbf16>
    %c0_1 = arith.constant 0 : index
    %c0_2 = arith.constant 0 : index
    %7 = vector.load %arg7[%c0_1, %c0_2] : memref<128x128xf32, #tpu.memory_space<vmem>>, vector<128x128xf32>
    %c0_3 = arith.constant 0 : index
    %c0_4 = arith.constant 0 : index
    %8 = vector.load %arg2[%c0_3, %c0_4] : memref<128x128xbf16, #tpu.memory_space<vmem>>, vector<128x128xbf16>
    %cst = arith.constant dense<0.000000e+00> : vector<128x128xf32>
    %9 = tpu.matmul %8, %6, %cst {dimension_numbers = #tpu.dot_dimension_numbers<[1], [0], [0], [1], [0, 0, 1, 1], [], []>} : vector<128x128xbf16>, vector<128x128xbf16>, vector<128x128xf32> -> vector<128x128xf32>
    %10 = arith.addf %7, %9 : vector<128x128xf32>
    %c0_5 = arith.constant 0 : index
    %c0_6 = arith.constant 0 : index
    %11 = vector.load %arg7[%c0_5, %c0_6] : memref<128x128xf32, #tpu.memory_space<vmem>>, vector<128x128xf32>
    tpu.vector_store %arg7[%c0_5, %c0_6], %10 {strides = array<i32>} : memref<128x128xf32, #tpu.memory_space<vmem>>, vector<128x128xf32>,
    %c0_i32_7 = arith.constant 0 : i32
    %12 = arith.cmpi eq, %arg1, %c0_i32_7 : i32
    %13 = arith.extui %12 : i1 to i32
    %c0_i32_8 = arith.constant 0 : i32
    %14 = arith.cmpi ne, %13, %c0_i32_8 : i32
    scf.if %14 {
      %c0_9 = arith.constant 0 : index
      %c0_10 = arith.constant 0 : index
      %15 = vector.load %arg7[%c0_9, %c0_10] : memref<128x128xf32, #tpu.memory_space<vmem>>, vector<128x128xf32>
      %c0_11 = arith.constant 0 : index
      %c0_12 = arith.constant 0 : index
      %16 = vector.load %arg4[%c0_11, %c0_12] : memref<1x128xf32, #tpu.memory_space<vmem>>, vector<1x128xf32>
      %17 = vector.broadcast %16 : vector<1x128xf32> to vector<128x128xf32>
      %18 = arith.addf %15, %17 : vector<128x128xf32>
      %cst_13 = arith.constant 0.000000e+00 : f32
      %19 = vector.broadcast %cst_13 : f32 to vector<128x128xf32>
      %20 = arith.maximumf %18, %19 : vector<128x128xf32>
      %21 = arith.truncf %20 : vector<128x128xf32> to vector<128x128xbf16>
      %c0_14 = arith.constant 0 : index
      %c0_15 = arith.constant 0 : index
      %22 = vector.load %arg5[%c0_14, %c0_15] : memref<128x128xbf16, #tpu.memory_space<vmem>>, vector<128x128xbf16>
      %cst_16 = arith.constant dense<0.000000e+00> : vector<128x128xf32>
      %23 = tpu.matmul %21, %22, %cst_16 {dimension_numbers = #tpu.dot_dimension_numbers<[1], [0], [0], [1], [0, 0, 1, 1], [], []>} : vector<128x128xbf16>, vector<128x128xbf16>, vector<128x128xf32> -> vector<128x128xf32>
      %24 = arith.truncf %23 : vector<128x128xf32> to vector<128x128xbf16>
      %c0_17 = arith.constant 0 : index
      %c0_18 = arith.constant 0 : index
      %25 = vector.load %arg6[%c0_17, %c0_18] : memref<128x128xbf16, #tpu.memory_space<vmem>>, vector<128x128xbf16>
      tpu.vector_store %arg6[%c0_17, %c0_18], %24 {strides = array<i32>} : memref<128x128xbf16, #tpu.memory_space<vmem>>, vector<128x128xbf16>,
    } else {
    }
    return
  }
  func.func @transform_0(%arg0: i32, %arg1: i32) -> (i32, i32) {
    %c0_i32 = arith.constant 0 : i32
    return %arg0, %arg1 : i32, i32
  }
  func.func @transform_1(%arg0: i32, %arg1: i32) -> (i32, i32) {
    %c0_i32 = arith.constant 0 : i32
    %c0_i32_0 = arith.constant 0 : i32
    %c0_i32_1 = arith.constant 0 : i32
    return %c0_i32, %c0_i32_0 : i32, i32
  }
  func.func @transform_2(%arg0: i32, %arg1: i32) -> (i32, i32) {
    %c0_i32 = arith.constant 0 : i32
    %c0_i32_0 = arith.constant 0 : i32
    %c0_i32_1 = arith.constant 0 : i32
    return %c0_i32, %c0_i32_0 : i32, i32
  }
  func.func @transform_3(%arg0: i32, %arg1: i32) -> (i32, i32) {
    %c0_i32 = arith.constant 0 : i32
    %c0_i32_0 = arith.constant 0 : i32
    %c0_i32_1 = arith.constant 0 : i32
    return %c0_i32, %c0_i32_0 : i32, i32
  }
  func.func @transform_4(%arg0: i32, %arg1: i32) -> (i32, i32) {
    %c0_i32 = arith.constant 0 : i32
    %c0_i32_0 = arith.constant 0 : i32
    return %arg0, %c0_i32 : i32, i32
  }
}

module attributes {stable_mosaic.version = 11 : i64} {
  func.func @kernel(%arg0: i32, %arg1: i32, %arg2: memref<128x128xbf16, #tpu.memory_space<vmem>>, %arg3: memref<128x128xbf16, #tpu.memory_space<vmem>>, %arg4: memref<1x128xf32, #tpu.memory_space<vmem>>, %arg5: memref<128x128xf32, #tpu.memory_space<vmem>>, %arg6: memref<128x128xf32, #tpu.memory_space<vmem>>) attributes {dimension_semantics = [#tpu.dimension_semantics<parallel>, #tpu.dimension_semantics<arbitrary>], iteration_bounds = array<i64: 1, 1>, scalar_prefetch = 0 : i64, scratch_operands = 1 : i64, tpu.core_type = #tpu.core_type<tc>, window_params = [{transform_indices = @transform_0, window_bounds = array<i64: 128, 128>}, {pipeline_mode = #tpu.pipeline_mode<synchronous>, transform_indices = @transform_1, window_bounds = array<i64: 128, 128>}, {pipeline_mode = #tpu.pipeline_mode<synchronous>, transform_indices = @transform_2, window_bounds = array<i64: 1, 128>}, {transform_indices = @transform_3, window_bounds = array<i64: 128, 128>}]} {
    %c0_i32 = arith.constant 0 : i32
    %0 = arith.cmpi eq, %arg1, %c0_i32 : i32
    %1 = arith.extui %0 : i1 to i32
    %c0_i32_0 = arith.constant 0 : i32
    %2 = arith.cmpi ne, %1, %c0_i32_0 : i32
    scf.if %2 {
      %cst_9 = arith.constant 0.000000e+00 : f32
      %15 = vector.broadcast %cst_9 : f32 to vector<128x128xf32>
      %c0_10 = arith.constant 0 : index
      %c0_11 = arith.constant 0 : index
      %16 = vector.load %arg6[%c0_10, %c0_11] : memref<128x128xf32, #tpu.memory_space<vmem>>, vector<128x128xf32>
      tpu.vector_store %arg6[%c0_10, %c0_11], %15 {strides = array<i32>} : memref<128x128xf32, #tpu.memory_space<vmem>>, vector<128x128xf32>,
    } else {
    }
    %c128_i32 = arith.constant 128 : i32
    %3 = arith.muli %arg1, %c128_i32 : i32
    %4 = tpu.assume_multiple %3, 128 : i32
    %5 = arith.index_cast %4 : i32 to index
    %c0 = arith.constant 0 : index
    %6 = vector.load %arg3[%5, %c0] : memref<128x128xbf16, #tpu.memory_space<vmem>>, vector<128x128xbf16>
    %c0_1 = arith.constant 0 : index
    %c0_2 = arith.constant 0 : index
    %7 = vector.load %arg6[%c0_1, %c0_2] : memref<128x128xf32, #tpu.memory_space<vmem>>, vector<128x128xf32>
    %c0_3 = arith.constant 0 : index
    %c0_4 = arith.constant 0 : index
    %8 = vector.load %arg2[%c0_3, %c0_4] : memref<128x128xbf16, #tpu.memory_space<vmem>>, vector<128x128xbf16>
    %cst = arith.constant dense<0.000000e+00> : vector<128x128xf32>
    %9 = tpu.matmul %8, %6, %cst {dimension_numbers = #tpu.dot_dimension_numbers<[1], [0], [0], [1], [0, 0, 1, 1], [], []>} : vector<128x128xbf16>, vector<128x128xbf16>, vector<128x128xf32> -> vector<128x128xf32>
    %10 = arith.addf %7, %9 : vector<128x128xf32>
    %c0_5 = arith.constant 0 : index
    %c0_6 = arith.constant 0 : index
    %11 = vector.load %arg6[%c0_5, %c0_6] : memref<128x128xf32, #tpu.memory_space<vmem>>, vector<128x128xf32>
    tpu.vector_store %arg6[%c0_5, %c0_6], %10 {strides = array<i32>} : memref<128x128xf32, #tpu.memory_space<vmem>>, vector<128x128xf32>,
    %c0_i32_7 = arith.constant 0 : i32
    %12 = arith.cmpi eq, %arg1, %c0_i32_7 : i32
    %13 = arith.extui %12 : i1 to i32
    %c0_i32_8 = arith.constant 0 : i32
    %14 = arith.cmpi ne, %13, %c0_i32_8 : i32
    scf.if %14 {
      %c0_9 = arith.constant 0 : index
      %c0_10 = arith.constant 0 : index
      %15 = vector.load %arg6[%c0_9, %c0_10] : memref<128x128xf32, #tpu.memory_space<vmem>>, vector<128x128xf32>
      %c0_11 = arith.constant 0 : index
      %c0_12 = arith.constant 0 : index
      %16 = vector.load %arg4[%c0_11, %c0_12] : memref<1x128xf32, #tpu.memory_space<vmem>>, vector<1x128xf32>
      %17 = vector.broadcast %16 : vector<1x128xf32> to vector<128x128xf32>
      %18 = arith.addf %15, %17 : vector<128x128xf32>
      %c0_13 = arith.constant 0 : index
      %c0_14 = arith.constant 0 : index
      %19 = vector.load %arg5[%c0_13, %c0_14] : memref<128x128xf32, #tpu.memory_space<vmem>>, vector<128x128xf32>
      tpu.vector_store %arg5[%c0_13, %c0_14], %18 {strides = array<i32>} : memref<128x128xf32, #tpu.memory_space<vmem>>, vector<128x128xf32>,
    } else {
    }
    return
  }
  func.func @transform_0(%arg0: i32, %arg1: i32) -> (i32, i32) {
    %c0_i32 = arith.constant 0 : i32
    return %arg0, %arg1 : i32, i32
  }
  func.func @transform_1(%arg0: i32, %arg1: i32) -> (i32, i32) {
    %c0_i32 = arith.constant 0 : i32
    %c0_i32_0 = arith.constant 0 : i32
    %c0_i32_1 = arith.constant 0 : i32
    return %c0_i32, %c0_i32_0 : i32, i32
  }
  func.func @transform_2(%arg0: i32, %arg1: i32) -> (i32, i32) {
    %c0_i32 = arith.constant 0 : i32
    %c0_i32_0 = arith.constant 0 : i32
    %c0_i32_1 = arith.constant 0 : i32
    return %c0_i32, %c0_i32_0 : i32, i32
  }
  func.func @transform_3(%arg0: i32, %arg1: i32) -> (i32, i32) {
    %c0_i32 = arith.constant 0 : i32
    %c0_i32_0 = arith.constant 0 : i32
    return %arg0, %c0_i32 : i32, i32
  }
}

</mosaic_0001>

<bundles_post_ra>
// kernel: gcn_forward_padded.3
= control target key start
LH: loop header
LB: loop body
LE: loop exit
PB: predicated region body
PF: predicated region fallthrough
CT: control target
= control target key end

     0   :  { %7 = vsyncpa [#allocation3], 0  ;;  %s514_s0 = inlined_call_operand.hbm [shape: bf16[128,128], index: 0, kind: input, shape index: {}]   ;;  %s515_s1 = inlined_call_operand.hbm [shape: bf16[128,128], index: 1, kind: input, shape index: {}]   ;;  %s516_s2 = inlined_call_operand.vmem [shape: bf16[128,128], index: 2, kind: output, shape index: {}]  }
   0x1   :  { %s13_s11 = sshll.u32 %s514_s0, 4  ;;  %s14_s11 = int_to_ptr.hbm [resolvable:$true] %s13_s11 }
   0x2   :  { %8 = vsyncpa [#allocation5], 0  ;;  %s465_s12 = smov [#allocation2]   ;;  %s26_s16 = sshll.u32 %s515_s1, 4  ;;  %s27_s16 = int_to_ptr.hbm [resolvable:$true] %s26_s16 }
   0x3   :  { %s15_s13 = sshll.u32 %s465_s12, 4  ;;  %s466_s17 = smov 64   ;;  %s16_s13 = int_to_ptr.vmem [resolvable:$true] %s15_s13 }
   0x4   :  { %s467_s18 = smov 4   ;;  %s468_s19 = smov [#allocation4]  }
   0x5   :  { %21 = dma.hbm_to_vmem [thread:$0]  %s14_s11, 1024, %s16_s13, [#allocation3], %s466_s17, %s466_s17, %s467_s18  }
   0x6   :  { %s28_s20 = sshll.u32 %s468_s19, 4  ;;  %s29_s20 = int_to_ptr.vmem [resolvable:$true] %s28_s20 }
   0x7   :  { %34 = dma.hbm_to_vmem [thread:$0]  %s27_s16, 1024, %s29_s20, [#allocation5], %s466_s17, %s466_s17, %s467_s18  }
   0x8   :  { %461 = dma.done.wait [#allocation3], 1024  }
   0x9   :  { %462 = vsyncadd [#allocation3], 4294966272 }
   0xa   :  { %463 = dma.done.wait [#allocation5], 1024  }
   0xb   :  { %464 = vsyncadd [#allocation5], 4294966272  ;;  %v337_v0 = vld [vmem:[#allocation4 + $0x38] sm:$0xff]  ;;  %v336_v1 = vld [vmem:[#allocation4 + $0x30] sm:$0xff] }
   0xc   :  { %171 = vmatpush.bf16.msra.mxu0 %v337_v0  ;;  %385 = vmatpush.bf16.msra.mxu1 %v337_v0  ;;  %v335_v2 = vld [vmem:[#allocation4 + $0x28] sm:$0xff]  ;;  %v334_v3 = vld [vmem:[#allocation4 + $0x20] sm:$0xff]  ;;  %v333_v4 = vld [vmem:[#allocation4 + $0x18] sm:$0xff] }
   0xd   :  { %386 = vmatpush.bf16.msra.mxu2 %v337_v0  ;;  %387 = vmatpush.bf16.msra.mxu3 %v337_v0  ;;  %v332_v5 = vld [vmem:[#allocation4 + $0x10] sm:$0xff]  ;;  %v331_v6 = vld [vmem:[#allocation4 + $0x8] sm:$0xff]  ;;  %v330_v7 = vld [vmem:[#allocation4] sm:$0xff] }
   0xe   :  { %v322_v8 = vld [vmem:[#allocation2] sm:$0xff]  ;;  %v324_v9 = vld [vmem:[#allocation2 + $0x10] sm:$0xff]  ;;  %v323_v12 = vld [vmem:[#allocation2 + $0x8] sm:$0xff] }
   0xf   :  { %v326_v10 = vld [vmem:[#allocation2 + $0x20] sm:$0xff]  ;;  %v328_v11 = vld [vmem:[#allocation2 + $0x30] sm:$0xff]  ;;  %v325_v13 = vld [vmem:[#allocation2 + $0x18] sm:$0xff] }
  0x10   :  { %172 = vmatpush.bf16.msra.mxu0 %v336_v1  ;;  %388 = vmatpush.bf16.msra.mxu1 %v336_v1  ;;  %v327_v14 = vld [vmem:[#allocation2 + $0x28] sm:$0xff]  ;;  %v329_v15 = vld [vmem:[#allocation2 + $0x38] sm:$0xff] }
  0x11   :  { %389 = vmatpush.bf16.msra.mxu2 %v336_v1  ;;  %390 = vmatpush.bf16.msra.mxu3 %v336_v1 }
  0x14   :  { %173 = vmatpush.bf16.msra.mxu0 %v335_v2  ;;  %391 = vmatpush.bf16.msra.mxu1 %v335_v2 }
  0x15   :  { %392 = vmatpush.bf16.msra.mxu2 %v335_v2  ;;  %393 = vmatpush.bf16.msra.mxu3 %v335_v2 }
  0x18   :  { %174 = vmatpush.bf16.msra.mxu0 %v334_v3  ;;  %394 = vmatpush.bf16.msra.mxu1 %v334_v3 }
  0x19   :  { %395 = vmatpush.bf16.msra.mxu2 %v334_v3  ;;  %396 = vmatpush.bf16.msra.mxu3 %v334_v3 }
  0x1c   :  { %175 = vmatpush.bf16.msra.mxu0 %v333_v4  ;;  %397 = vmatpush.bf16.msra.mxu1 %v333_v4 }
  0x1d   :  { %398 = vmatpush.bf16.msra.mxu2 %v333_v4  ;;  %399 = vmatpush.bf16.msra.mxu3 %v333_v4 }
  0x20   :  { %176 = vmatpush.bf16.msra.mxu0 %v332_v5  ;;  %400 = vmatpush.bf16.msra.mxu1 %v332_v5 }
  0x21   :  { %401 = vmatpush.bf16.msra.mxu2 %v332_v5  ;;  %402 = vmatpush.bf16.msra.mxu3 %v332_v5 }
  0x24   :  { %177 = vmatpush.bf16.msra.mxu0 %v331_v6  ;;  %403 = vmatpush.bf16.msra.mxu1 %v331_v6 }
  0x25   :  { %404 = vmatpush.bf16.msra.mxu2 %v331_v6  ;;  %405 = vmatpush.bf16.msra.mxu3 %v331_v6 }
  0x28   :  { %178 = vmatpush.bf16.msra.mxu0 %v330_v7  ;;  %406 = vmatpush.bf16.msra.mxu1 %v330_v7 }
  0x29   :  { %407 = vmatpush.bf16.msra.mxu2 %v330_v7  ;;  %408 = vmatpush.bf16.msra.mxu3 %v330_v7 }
  0x2b   :  { %179 = vmatmul.bf16.vlgmr.msra.gmra.mxu0 %v322_v8  ;;  %189 = vmatmul.bf16.vlgmr.msra.gmra.mxu1 %v324_v9 }
  0x2c   :  { %199 = vmatmul.bf16.vlgmr.msra.gmra.mxu2 %v326_v10  ;;  %209 = vmatmul.bf16.vlgmr.msra.gmra.mxu3 %v328_v11 }
  0x3b   :  { %184 = vmatmul.bf16.gmra.mxu0 %v323_v12  ;;  %194 = vmatmul.bf16.gmra.mxu1 %v325_v13 }
  0x3c   :  { %204 = vmatmul.bf16.gmra.mxu2 %v327_v14  ;;  %214 = vmatmul.bf16.gmra.mxu3 %v329_v15 }
  0xa8   :  { %v180_v16 = vpop.f32.mrf.mxu0  ;;  %v190_v17 = vpop.f32.mrf.mxu1 }
  0xaf   :  { %v200_v18 = vpop.f32.mrf.mxu2  ;;  %v210_v19 = vpop.f32.mrf.mxu3 }
  0xb0   :  { %v182_v20 = vpop.f32.mrf.mxu0  ;;  %v192_v21 = vpop.f32.mrf.mxu1 }
  0xb1   :  { %v341_v22 = vpack.c.bf16 %v182_v20, %v180_v16  ;;  %v351_v23 = vpack.c.bf16 %v192_v21, %v190_v17 }
  0xb3   :  { %342 = vst [vmem:[%s516_s2] sm:$0xff] %v341_v22  }
  0xb4   :  { %379 = vst [vmem:[%s516_s2 + $0x10] sm:$0xff] %v351_v23  }
  0xb7   :  { %v202_v24 = vpop.f32.mrf.mxu2  ;;  %v212_v25 = vpop.f32.mrf.mxu3 }
  0xb8   :  { %v361_v26 = vpack.c.bf16 %v202_v24, %v200_v18  ;;  %v371_v27 = vpack.c.bf16 %v212_v25, %v210_v19  ;;  %v185_v28 = vpop.f32.mrf.mxu0  ;;  %v195_v29 = vpop.f32.mrf.mxu1 }
  0xba   :  { %381 = vst [vmem:[%s516_s2 + $0x20] sm:$0xff] %v361_v26  }
  0xbb   :  { %383 = vst [vmem:[%s516_s2 + $0x30] sm:$0xff] %v371_v27  }
  0xbf   :  { %v205_v30 = vpop.f32.mrf.mxu2  ;;  %v215_v31 = vpop.f32.mrf.mxu3 }
  0xc0   :  { %v187_v32 = vpop.f32.mrf.mxu0  ;;  %v197_v33 = vpop.f32.mrf.mxu1 }
  0xc1   :  { %v346_v34 = vpack.c.bf16 %v187_v32, %v185_v28  ;;  %v356_v35 = vpack.c.bf16 %v197_v33, %v195_v29 }
  0xc3   :  { %378 = vst [vmem:[%s516_s2 + $0x8] sm:$0xff] %v346_v34  }
  0xc4   :  { %380 = vst [vmem:[%s516_s2 + $0x18] sm:$0xff] %v356_v35  }
  0xc7   :  { %v207_v36 = vpop.f32.mrf.mxu2  ;;  %v217_v37 = vpop.f32.mrf.mxu3 }
  0xc8   :  { %v366_v38 = vpack.c.bf16 %v207_v36, %v205_v30  ;;  %v376_v39 = vpack.c.bf16 %v217_v37, %v215_v31 }
  0xca   :  { %382 = vst [vmem:[%s516_s2 + $0x28] sm:$0xff] %v366_v38  }
  0xcb   :  { %384 = vst [vmem:[%s516_s2 + $0x38] sm:$0xff] %v376_v39  }
  0xcc   :  { %256 = vsyncpa [#allocation3], 1 }
  0xcd   :  { %257 = vsyncpa [#allocation5], 1 }

// kernel: gcn_forward_padded.5
= control target key start
LH: loop header
LB: loop body
LE: loop exit
PB: predicated region body
PF: predicated region fallthrough
CT: control target
= control target key end

     0   :  { %s551_s0 = inlined_call_operand.vmem [shape: bf16[128,128], index: 0, kind: input, shape index: {}]   ;;  %s552_s1 = inlined_call_operand.vmem [shape: bf16[128,128], index: 1, kind: input, shape index: {}]   ;;  %s553_s2 = inlined_call_operand.vmem [shape: f32[1,128], index: 2, kind: input, shape index: {}]   ;;  %s554_s3 = inlined_call_operand.hbm [shape: f32[128,128], index: 3, kind: output, shape index: {}]  }
   0x1   :  { %v411_v0 = vld [vmem:[%s552_s1 + $0x38] sm:$0xff]  ;;  %v410_v1 = vld [vmem:[%s552_s1 + $0x30] sm:$0xff] }
   0x2   :  { %184 = vmatpush.bf16.msra.mxu0 %v411_v0  ;;  %420 = vmatpush.bf16.msra.mxu1 %v411_v0 }
   0x3   :  { %421 = vmatpush.bf16.msra.mxu2 %v411_v0  ;;  %422 = vmatpush.bf16.msra.mxu3 %v411_v0 }
   0x4   :  { %8 = vsyncpa [#allocation4], 0  ;;  %v409_v2 = vld [vmem:[%s552_s1 + $0x28] sm:$0xff]  ;;  %v408_v3 = vld [vmem:[%s552_s1 + $0x20] sm:$0xff]  ;;  %s326_s20 = sshll.u32 %s554_s3, 4  ;;  %s475_s21 = smov 128   ;;  %s327_s20 = int_to_ptr.hbm [resolvable:$true] %s326_s20 }
   0x5   :  { %v407_v4 = vld [vmem:[%s552_s1 + $0x18] sm:$0xff]  ;;  %v406_v5 = vld [vmem:[%s552_s1 + $0x10] sm:$0xff]  ;;  %v405_v6 = vld [vmem:[%s552_s1 + $0x8] sm:$0xff]  ;;  %s476_s22 = smov 8  }
   0x6   :  { %185 = vmatpush.bf16.msra.mxu0 %v410_v1  ;;  %423 = vmatpush.bf16.msra.mxu1 %v410_v1  ;;  %v404_v7 = vld [vmem:[%s552_s1] sm:$0xff]  ;;  %v414_v9 = vld [vmem:[%s551_s0 + $0x10] sm:$0xff]  ;;  %v413_v12 = vld [vmem:[%s551_s0 + $0x8] sm:$0xff] }
   0x7   :  { %424 = vmatpush.bf16.msra.mxu2 %v410_v1  ;;  %425 = vmatpush.bf16.msra.mxu3 %v410_v1  ;;  %v412_v8 = vld [vmem:[%s551_s0] sm:$0xff]  ;;  %v418_v11 = vld [vmem:[%s551_s0 + $0x30] sm:$0xff]  ;;  %v415_v13 = vld [vmem:[%s551_s0 + $0x18] sm:$0xff] }
   0x8   :  { %v416_v10 = vld [vmem:[%s551_s0 + $0x20] sm:$0xff]  ;;  %v417_v14 = vld [vmem:[%s551_s0 + $0x28] sm:$0xff]  ;;  %v419_v15 = vld [vmem:[%s551_s0 + $0x38] sm:$0xff]  ;;  %s474_s0 = smov [#allocation3]  }
   0x9   :  { %v447_v16 = vld [vmem:[%s553_s2] ss:$0 sm:$0xff]  ;;  %s324_s2 = sshll.u32 %s474_s0, 4  ;;  %s325_s2 = int_to_ptr.vmem [resolvable:$true] %s324_s2 }
   0xa   :  { %186 = vmatpush.bf16.msra.mxu0 %v409_v2  ;;  %426 = vmatpush.bf16.msra.mxu1 %v409_v2 }
   0xb   :  { %427 = vmatpush.bf16.msra.mxu2 %v409_v2  ;;  %428 = vmatpush.bf16.msra.mxu3 %v409_v2 }
   0xe   :  { %187 = vmatpush.bf16.msra.mxu0 %v408_v3  ;;  %429 = vmatpush.bf16.msra.mxu1 %v408_v3 }
   0xf   :  { %430 = vmatpush.bf16.msra.mxu2 %v408_v3  ;;  %431 = vmatpush.bf16.msra.mxu3 %v408_v3 }
  0x12   :  { %188 = vmatpush.bf16.msra.mxu0 %v407_v4  ;;  %432 = vmatpush.bf16.msra.mxu1 %v407_v4 }
  0x13   :  { %433 = vmatpush.bf16.msra.mxu2 %v407_v4  ;;  %434 = vmatpush.bf16.msra.mxu3 %v407_v4 }
  0x16   :  { %189 = vmatpush.bf16.msra.mxu0 %v406_v5  ;;  %435 = vmatpush.bf16.msra.mxu1 %v406_v5 }
  0x17   :  { %436 = vmatpush.bf16.msra.mxu2 %v406_v5  ;;  %437 = vmatpush.bf16.msra.mxu3 %v406_v5 }
  0x1a   :  { %190 = vmatpush.bf16.msra.mxu0 %v405_v6  ;;  %438 = vmatpush.bf16.msra.mxu1 %v405_v6 }
  0x1b   :  { %439 = vmatpush.bf16.msra.mxu2 %v405_v6  ;;  %440 = vmatpush.bf16.msra.mxu3 %v405_v6 }
  0x1e   :  { %191 = vmatpush.bf16.msra.mxu0 %v404_v7  ;;  %441 = vmatpush.bf16.msra.mxu1 %v404_v7 }
  0x1f   :  { %442 = vmatpush.bf16.msra.mxu2 %v404_v7  ;;  %443 = vmatpush.bf16.msra.mxu3 %v404_v7 }
  0x21   :  { %192 = vmatmul.bf16.vlgmr.msra.gmra.mxu0 %v412_v8  ;;  %202 = vmatmul.bf16.vlgmr.msra.gmra.mxu1 %v414_v9 }
  0x22   :  { %212 = vmatmul.bf16.vlgmr.msra.gmra.mxu2 %v416_v10  ;;  %222 = vmatmul.bf16.vlgmr.msra.gmra.mxu3 %v418_v11 }
  0x31   :  { %197 = vmatmul.bf16.gmra.mxu0 %v413_v12  ;;  %207 = vmatmul.bf16.gmra.mxu1 %v415_v13 }
  0x32   :  { %217 = vmatmul.bf16.gmra.mxu2 %v417_v14  ;;  %227 = vmatmul.bf16.gmra.mxu3 %v419_v15 }
  0x9e   :  { %v193_v17 = vpop.f32.mrf.mxu0  ;;  %v203_v18 = vpop.f32.mrf.mxu1 }
  0x9f   :  { %v288_v19 = vadd.f32 %v447_v16, %v193_v17  ;;  %v292_v20 = vadd.f32 %v447_v16, %v203_v18 }
  0xa1   :  { %304 = vst [vmem:[#allocation3] sm:$0xff] %v288_v19 }
  0xa2   :  { %308 = vst [vmem:[#allocation3 + $0x20] sm:$0xff] %v292_v20 }
  0xa5   :  { %v213_v21 = vpop.f32.mrf.mxu2  ;;  %v223_v22 = vpop.f32.mrf.mxu3 }
  0xa6   :  { %v296_v23 = vadd.f32 %v447_v16, %v213_v21  ;;  %v300_v24 = vadd.f32 %v447_v16, %v223_v22  ;;  %v195_v25 = vpop.f32.mrf.mxu0  ;;  %v205_v26 = vpop.f32.mrf.mxu1 }
  0xa7   :  { %v289_v27 = vadd.f32 %v447_v16, %v195_v25  ;;  %v293_v28 = vadd.f32 %v447_v16, %v205_v26 }
  0xa8   :  { %312 = vst [vmem:[#allocation3 + $0x40] sm:$0xff] %v296_v23 }
  0xa9   :  { %316 = vst [vmem:[#allocation3 + $0x60] sm:$0xff] %v300_v24 }
  0xaa   :  { %305 = vst [vmem:[#allocation3 + $0x8] sm:$0xff] %v289_v27 }
  0xab   :  { %309 = vst [vmem:[#allocation3 + $0x28] sm:$0xff] %v293_v28 }
  0xad   :  { %v215_v29 = vpop.f32.mrf.mxu2  ;;  %v225_v30 = vpop.f32.mrf.mxu3 }
  0xae   :  { %v297_v31 = vadd.f32 %v447_v16, %v215_v29  ;;  %v301_v32 = vadd.f32 %v447_v16, %v225_v30  ;;  %v198_v33 = vpop.f32.mrf.mxu0  ;;  %v208_v34 = vpop.f32.mrf.mxu1 }
  0xaf   :  { %v290_v35 = vadd.f32 %v447_v16, %v198_v33  ;;  %v294_v36 = vadd.f32 %v447_v16, %v208_v34 }
  0xb0   :  { %313 = vst [vmem:[#allocation3 + $0x48] sm:$0xff] %v297_v31 }
  0xb1   :  { %317 = vst [vmem:[#allocation3 + $0x68] sm:$0xff] %v301_v32 }
  0xb2   :  { %306 = vst [vmem:[#allocation3 + $0x10] sm:$0xff] %v290_v35 }
  0xb3   :  { %310 = vst [vmem:[#allocation3 + $0x30] sm:$0xff] %v294_v36 }
  0xb5   :  { %v218_v37 = vpop.f32.mrf.mxu2  ;;  %v228_v38 = vpop.f32.mrf.mxu3 }
  0xb6   :  { %v298_v39 = vadd.f32 %v447_v16, %v218_v37  ;;  %v302_v40 = vadd.f32 %v447_v16, %v228_v38  ;;  %v200_v41 = vpop.f32.mrf.mxu0  ;;  %v210_v42 = vpop.f32.mrf.mxu1 }
  0xb7   :  { %v291_v43 = vadd.f32 %v447_v16, %v200_v41  ;;  %v295_v44 = vadd.f32 %v447_v16, %v210_v42 }
  0xb8   :  { %314 = vst [vmem:[#allocation3 + $0x50] sm:$0xff] %v298_v39 }
  0xb9   :  { %318 = vst [vmem:[#allocation3 + $0x70] sm:$0xff] %v302_v40 }
  0xba   :  { %307 = vst [vmem:[#allocation3 + $0x18] sm:$0xff] %v291_v43 }
  0xbb   :  { %311 = vst [vmem:[#allocation3 + $0x38] sm:$0xff] %v295_v44 }
  0xbd   :  { %v220_v45 = vpop.f32.mrf.mxu2  ;;  %v230_v46 = vpop.f32.mrf.mxu3 }
  0xbe   :  { %v299_v47 = vadd.f32 %v447_v16, %v220_v45  ;;  %v303_v48 = vadd.f32 %v447_v16, %v230_v46 }
  0xc0   :  { %315 = vst [vmem:[#allocation3 + $0x58] sm:$0xff] %v299_v47 }
  0xc1   :  { %319 = vst [vmem:[#allocation3 + $0x78] sm:$0xff] %v303_v48 }
  0xc2   :  { %332 = dma.vmem_to_hbm [thread:$0]  %s325_s2, 2048, %s327_s20, [#allocation4], %s475_s21, %s475_s21, %s476_s22  }
  0xc3   :  { %472 = dma.done.wait [#allocation4], 2048  }
  0xc4   :  { %473 = vsyncadd [#allocation4], 4294965248 }
  0xc5   :  { %337 = vsyncpa [#allocation4], 1 }

// kernel: gcn_forward_padded.4
= control target key start
LH: loop header
LB: loop body
LE: loop exit
PB: predicated region body
PF: predicated region fallthrough
CT: control target
= control target key end

     0   :  { %s789_s1 = inlined_call_operand.vmem [shape: bf16[128,128], index: 1, kind: input, shape index: {}]   ;;  %s790_s2 = inlined_call_operand.vmem [shape: f32[1,128], index: 2, kind: input, shape index: {}]   ;;  %s791_s0 = inlined_call_operand.vmem [shape: bf16[128,128], index: 0, kind: input, shape index: {}]   ;;  %s792_s3 = inlined_call_operand.vmem [shape: bf16[128,128], index: 3, kind: input, shape index: {}]   ;;  %s793_s4 = inlined_call_operand.vmem [shape: bf16[128,128], index: 4, kind: output, shape index: {}]  }
   0x1   :  { %v584_v0 = vld [vmem:[%s789_s1 + $0x38] sm:$0xff]  ;;  %v583_v1 = vld [vmem:[%s789_s1 + $0x30] sm:$0xff]  ;;  %v582_v2 = vld [vmem:[%s789_s1 + $0x28] sm:$0xff] }
   0x2   :  { %186 = vmatpush.bf16.msra.mxu0 %v584_v0  ;;  %648 = vmatpush.bf16.msra.mxu2 %v584_v0  ;;  %v581_v3 = vld [vmem:[%s789_s1 + $0x20] sm:$0xff]  ;;  %v580_v4 = vld [vmem:[%s789_s1 + $0x18] sm:$0xff]  ;;  %v579_v5 = vld [vmem:[%s789_s1 + $0x10] sm:$0xff] }
   0x3   :  { %v578_v6 = vld [vmem:[%s789_s1 + $0x8] sm:$0xff]  ;;  %v577_v7 = vld [vmem:[%s789_s1] sm:$0xff]  ;;  %v600_v12 = vld [vmem:[%s792_s3 + $0x38] sm:$0xff] }
   0x4   :  { %v585_v8 = vld [vmem:[%s791_s0] sm:$0xff]  ;;  %v586_v10 = vld [vmem:[%s791_s0 + $0x8] sm:$0xff]  ;;  %394 = vmatpush.bf16.msra.mxu1 %v600_v12  ;;  %v599_v13 = vld [vmem:[%s792_s3 + $0x30] sm:$0xff]  ;;  %656 = vmatpush.bf16.msra.mxu3 %v600_v12 }
   0x5   :  { %v589_v9 = vld [vmem:[%s791_s0 + $0x20] sm:$0xff]  ;;  %v590_v11 = vld [vmem:[%s791_s0 + $0x28] sm:$0xff]  ;;  %v587_v16 = vld [vmem:[%s791_s0 + $0x10] sm:$0xff] }
   0x6   :  { %187 = vmatpush.bf16.msra.mxu0 %v583_v1  ;;  %649 = vmatpush.bf16.msra.mxu2 %v583_v1  ;;  %v598_v14 = vld [vmem:[%s792_s3 + $0x28] sm:$0xff]  ;;  %v597_v15 = vld [vmem:[%s792_s3 + $0x20] sm:$0xff]  ;;  %v591_v17 = vld [vmem:[%s791_s0 + $0x30] sm:$0xff] }
   0x7   :  { %v588_v18 = vld [vmem:[%s791_s0 + $0x18] sm:$0xff]  ;;  %v595_v21 = vld [vmem:[%s792_s3 + $0x10] sm:$0xff]  ;;  %v594_v22 = vld [vmem:[%s792_s3 + $0x8] sm:$0xff] }
   0x8   :  { %395 = vmatpush.bf16.msra.mxu1 %v599_v13  ;;  %657 = vmatpush.bf16.msra.mxu3 %v599_v13  ;;  %v592_v19 = vld [vmem:[%s791_s0 + $0x38] sm:$0xff]  ;;  %v593_v23 = vld [vmem:[%s792_s3] sm:$0xff] }
   0x9   :  { %v596_v20 = vld [vmem:[%s792_s3 + $0x18] sm:$0xff]  ;;  %v664_v25 = vld [vmem:[%s790_s2] ss:$0 sm:$0xff] }
   0xa   :  { %188 = vmatpush.bf16.msra.mxu0 %v582_v2  ;;  %650 = vmatpush.bf16.msra.mxu2 %v582_v2 }
   0xc   :  { %396 = vmatpush.bf16.msra.mxu1 %v598_v14  ;;  %658 = vmatpush.bf16.msra.mxu3 %v598_v14 }
   0xe   :  { %189 = vmatpush.bf16.msra.mxu0 %v581_v3  ;;  %651 = vmatpush.bf16.msra.mxu2 %v581_v3 }
  0x10   :  { %397 = vmatpush.bf16.msra.mxu1 %v597_v15  ;;  %659 = vmatpush.bf16.msra.mxu3 %v597_v15 }
  0x12   :  { %190 = vmatpush.bf16.msra.mxu0 %v580_v4  ;;  %652 = vmatpush.bf16.msra.mxu2 %v580_v4 }
  0x14   :  { %398 = vmatpush.bf16.msra.mxu1 %v596_v20  ;;  %660 = vmatpush.bf16.msra.mxu3 %v596_v20 }
  0x16   :  { %191 = vmatpush.bf16.msra.mxu0 %v579_v5  ;;  %653 = vmatpush.bf16.msra.mxu2 %v579_v5 }
  0x18   :  { %399 = vmatpush.bf16.msra.mxu1 %v595_v21  ;;  %661 = vmatpush.bf16.msra.mxu3 %v595_v21 }
  0x1a   :  { %192 = vmatpush.bf16.msra.mxu0 %v578_v6  ;;  %654 = vmatpush.bf16.msra.mxu2 %v578_v6 }
  0x1c   :  { %400 = vmatpush.bf16.msra.mxu1 %v594_v22  ;;  %662 = vmatpush.bf16.msra.mxu3 %v594_v22 }
  0x1e   :  { %193 = vmatpush.bf16.msra.mxu0 %v577_v7  ;;  %655 = vmatpush.bf16.msra.mxu2 %v577_v7 }
  0x20   :  { %401 = vmatpush.bf16.msra.mxu1 %v593_v23  ;;  %663 = vmatpush.bf16.msra.mxu3 %v593_v23 }
  0x21   :  { %194 = vmatmul.bf16.vlgmr.msra.gmra.mxu0 %v585_v8  ;;  %214 = vmatmul.bf16.vlgmr.msra.gmra.mxu2 %v589_v9 }
  0x31   :  { %199 = vmatmul.bf16.gmra.mxu0 %v586_v10  ;;  %219 = vmatmul.bf16.gmra.mxu2 %v590_v11 }
  0x41   :  { %204 = vmatmul.bf16.gmra.mxu0 %v587_v16  ;;  %224 = vmatmul.bf16.gmra.mxu2 %v591_v17 }
  0x51   :  { %209 = vmatmul.bf16.gmra.mxu0 %v588_v18  ;;  %229 = vmatmul.bf16.gmra.mxu2 %v592_v19 }
  0x9e   :  { %v195_v24 = vpop.f32.mrf.mxu0 }
  0x9f   :  { %v290_v26 = vadd.f32 %v664_v25, %v195_v24 }
  0xa1   :  { %v306_v29 = vmax.f32 %v290_v26, 0.0 }
  0xa4   :  { %v215_v27 = vpop.f32.mrf.mxu2 }
  0xa5   :  { %v298_v32 = vadd.f32 %v664_v25, %v215_v27 }
  0xa6   :  { %v197_v28 = vpop.f32.mrf.mxu0 }
  0xa7   :  { %v291_v30 = vadd.f32 %v664_v25, %v197_v28  ;;  %v314_v37 = vmax.f32 %v298_v32, 0.0 }
  0xa9   :  { %v307_v31 = vmax.f32 %v291_v30, 0.0 }
  0xab   :  { %v322_v33 = vpack.c.bf16 %v307_v31, %v306_v29 }
  0xac   :  { %v217_v34 = vpop.f32.mrf.mxu2 }
  0xad   :  { %v299_v35 = vadd.f32 %v664_v25, %v217_v34  ;;  %402 = vmatmul.bf16.vlgmr.msra.gmra.mxu1 %v322_v33 }
  0xae   :  { %v200_v36 = vpop.f32.mrf.mxu0 }
  0xaf   :  { %v315_v38 = vmax.f32 %v299_v35, 0.0  ;;  %v292_v40 = vadd.f32 %v664_v25, %v200_v36 }
  0xb1   :  { %v326_v39 = vpack.c.bf16 %v315_v38, %v314_v37  ;;  %v308_v43 = vmax.f32 %v292_v40, 0.0 }
  0xb3   :  { %422 = vmatmul.bf16.vlgmr.msra.gmra.mxu3 %v326_v39 }
  0xb4   :  { %v220_v41 = vpop.f32.mrf.mxu2 }
  0xb5   :  { %v300_v46 = vadd.f32 %v664_v25, %v220_v41 }
  0xb6   :  { %v202_v42 = vpop.f32.mrf.mxu0 }
  0xb7   :  { %v293_v44 = vadd.f32 %v664_v25, %v202_v42  ;;  %v316_v51 = vmax.f32 %v300_v46, 0.0 }
  0xb9   :  { %v309_v45 = vmax.f32 %v293_v44, 0.0 }
  0xbb   :  { %v323_v47 = vpack.c.bf16 %v309_v45, %v308_v43 }
  0xbc   :  { %v222_v48 = vpop.f32.mrf.mxu2 }
  0xbd   :  { %v301_v49 = vadd.f32 %v664_v25, %v222_v48  ;;  %407 = vmatmul.bf16.gmra.mxu1 %v323_v47 }
  0xbe   :  { %v205_v50 = vpop.f32.mrf.mxu0 }
  0xbf   :  { %v317_v52 = vmax.f32 %v301_v49, 0.0  ;;  %v294_v54 = vadd.f32 %v664_v25, %v205_v50 }
  0xc1   :  { %v327_v53 = vpack.c.bf16 %v317_v52, %v316_v51  ;;  %v310_v57 = vmax.f32 %v294_v54, 0.0 }
  0xc3   :  { %427 = vmatmul.bf16.gmra.mxu3 %v327_v53 }
  0xc4   :  { %v225_v55 = vpop.f32.mrf.mxu2 }
  0xc5   :  { %v302_v60 = vadd.f32 %v664_v25, %v225_v55 }
  0xc6   :  { %v207_v56 = vpop.f32.mrf.mxu0 }
  0xc7   :  { %v295_v58 = vadd.f32 %v664_v25, %v207_v56  ;;  %v318_v1 = vmax.f32 %v302_v60, 0.0 }
  0xc9   :  { %v311_v59 = vmax.f32 %v295_v58, 0.0 }
  0xcb   :  { %v324_v61 = vpack.c.bf16 %v311_v59, %v310_v57 }
  0xcc   :  { %v227_v62 = vpop.f32.mrf.mxu2 }
  0xcd   :  { %v303_v63 = vadd.f32 %v664_v25, %v227_v62  ;;  %412 = vmatmul.bf16.gmra.mxu1 %v324_v61 }
  0xce   :  { %v210_v0 = vpop.f32.mrf.mxu0 }
  0xcf   :  { %v319_v2 = vmax.f32 %v303_v63, 0.0  ;;  %v296_v4 = vadd.f32 %v664_v25, %v210_v0 }
  0xd1   :  { %v328_v3 = vpack.c.bf16 %v319_v2, %v318_v1  ;;  %v312_v7 = vmax.f32 %v296_v4, 0.0 }
  0xd3   :  { %432 = vmatmul.bf16.gmra.mxu3 %v328_v3 }
  0xd4   :  { %v230_v5 = vpop.f32.mrf.mxu2 }
  0xd5   :  { %v304_v10 = vadd.f32 %v664_v25, %v230_v5 }
  0xd6   :  { %v212_v6 = vpop.f32.mrf.mxu0 }
  0xd7   :  { %v297_v8 = vadd.f32 %v664_v25, %v212_v6  ;;  %v320_v14 = vmax.f32 %v304_v10, 0.0 }
  0xd9   :  { %v313_v9 = vmax.f32 %v297_v8, 0.0 }
  0xdb   :  { %v325_v11 = vpack.c.bf16 %v313_v9, %v312_v7 }
  0xdc   :  { %v232_v12 = vpop.f32.mrf.mxu2 }
  0xdd   :  { %v305_v13 = vadd.f32 %v664_v25, %v232_v12  ;;  %417 = vmatmul.bf16.gmra.mxu1 %v325_v11 }
  0xdf   :  { %v321_v15 = vmax.f32 %v305_v13, 0.0 }
  0xe1   :  { %v329_v16 = vpack.c.bf16 %v321_v15, %v320_v14 }
  0xe3   :  { %437 = vmatmul.bf16.gmra.mxu3 %v329_v16 }
 0x12a   :  { %v403_v17 = vpop.f32.mrf.mxu1 }
 0x132   :  { %v405_v18 = vpop.f32.mrf.mxu1 }
 0x133   :  { %v604_v19 = vpack.c.bf16 %v405_v18, %v403_v17 }
 0x135   :  { %605 = vst [vmem:[%s793_s4] sm:$0xff] %v604_v19  }
 0x136   :  { %v423_v20 = vpop.f32.mrf.mxu3 }
 0x13a   :  { %v408_v21 = vpop.f32.mrf.mxu1 }
 0x13e   :  { %v425_v22 = vpop.f32.mrf.mxu3 }
 0x13f   :  { %v624_v23 = vpack.c.bf16 %v425_v22, %v423_v20 }
 0x141   :  { %644 = vst [vmem:[%s793_s4 + $0x20] sm:$0xff] %v624_v23  }
 0x142   :  { %v410_v24 = vpop.f32.mrf.mxu1 }
 0x143   :  { %v609_v25 = vpack.c.bf16 %v410_v24, %v408_v21 }
 0x145   :  { %641 = vst [vmem:[%s793_s4 + $0x8] sm:$0xff] %v609_v25  }
 0x146   :  { %v428_v26 = vpop.f32.mrf.mxu3 }
 0x14a   :  { %v413_v27 = vpop.f32.mrf.mxu1 }
 0x14e   :  { %v430_v28 = vpop.f32.mrf.mxu3 }
 0x14f   :  { %v629_v29 = vpack.c.bf16 %v430_v28, %v428_v26 }
 0x151   :  { %645 = vst [vmem:[%s793_s4 + $0x28] sm:$0xff] %v629_v29  }
 0x152   :  { %v415_v30 = vpop.f32.mrf.mxu1 }
 0x153   :  { %v614_v31 = vpack.c.bf16 %v415_v30, %v413_v27 }
 0x155   :  { %642 = vst [vmem:[%s793_s4 + $0x10] sm:$0xff] %v614_v31  }
 0x156   :  { %v433_v32 = vpop.f32.mrf.mxu3 }
 0x15a   :  { %v418_v33 = vpop.f32.mrf.mxu1 }
 0x15e   :  { %v435_v34 = vpop.f32.mrf.mxu3 }
 0x15f   :  { %v634_v35 = vpack.c.bf16 %v435_v34, %v433_v32 }
 0x161   :  { %646 = vst [vmem:[%s793_s4 + $0x30] sm:$0xff] %v634_v35  }
 0x162   :  { %v420_v36 = vpop.f32.mrf.mxu1 }
 0x163   :  { %v619_v37 = vpack.c.bf16 %v420_v36, %v418_v33 }
 0x165   :  { %643 = vst [vmem:[%s793_s4 + $0x18] sm:$0xff] %v619_v37  }
 0x166   :  { %v438_v38 = vpop.f32.mrf.mxu3 }
 0x16e   :  { %v440_v39 = vpop.f32.mrf.mxu3 }
 0x16f   :  { %v639_v40 = vpack.c.bf16 %v440_v39, %v438_v38 }
 0x171   :  { %647 = vst [vmem:[%s793_s4 + $0x38] sm:$0xff] %v639_v40  }

</bundles_post_ra>
